<compile_context>
chip_gen: v7x
topology: tpu7x:2x2x1
jax: 0.10.0
libtpu: 0.0.40
codegen_flags: <defaults>
</compile_context>

<pallas_src>
import jax
import jax.numpy as jnp
from jax import lax
from jax.experimental import pallas as pl
from jax.experimental.pallas import tpu as pltpu


# ---------------------------------------------------------------------------
# Kernel
# ---------------------------------------------------------------------------
def rnn_chunk_kernel(x_ref,      # (tt, tb, Dp)  time-major input chunk
                     w_ih_ref,   # (Dp, Hp)      W_ih^T
                     b_ref,      # (1,  Hp)      b_ih + b_hh (combined, f32)
                     w_hh_ref,   # (Hp, Hp)      W_hh^T
                     w_out_ref,  # (Hp, Op)      W_linear^T
                     b_out_ref,  # (1,  Op)      b_linear (f32)
                     out_ref,    # (tt, tb, Op)  time-major output chunk
                     h_ref,      # (tb, Hp)      carried hidden state (f32, persistent)
                     hs_ref):    # (tt, tb, Hp)  chunk buffer: x-proj, then hidden states
    tt, tb, Dp = x_ref.shape
    Hp = w_hh_ref.shape[0]
    Op = w_out_ref.shape[1]

    # h_0 = 0 (PyTorch default) at the first time chunk of every batch block.
    @pl.when(pl.program_id(1) == 0)
    def _():
        h_ref[...] = jnp.zeros_like(h_ref)

    # 1) Hoisted input projection: one (tt*tb, Dp) x (Dp, Hp) GEMM per chunk,
    #    combined bias folded in once (no per-step broadcasts).
    x2d = x_ref[...].reshape(tt * tb, Dp)
    hs_ref[...] = (
        jnp.dot(x2d, w_ih_ref[...], preferred_element_type=jnp.float32)
        + b_ref[...]
    ).reshape(tt, tb, Hp)

    # 2) Serial recurrence: only h @ W_hh + tanh on the critical path.
    #    tt is a compile-time constant -> fully unrolled.
    w_hh = w_hh_ref[...]
    cdt = w_hh.dtype                      # compute dtype for MXU operands
    h = h_ref[...]                        # f32 carried state
    for t in range(tt):
        h = jnp.tanh(
            hs_ref[t]
            + jnp.dot(h.astype(cdt), w_hh, preferred_element_type=jnp.float32))
        hs_ref[t] = h                     # overwrite x-proj slot with hidden state
    h_ref[...] = h

    # 3) Deferred output projection: one (tt*tb, Hp) x (Hp, Op) GEMM per chunk,
    #    single lane-dense store of the whole output tile.
    h2d = hs_ref[...].reshape(tt * tb, Hp).astype(cdt)
    y = (jnp.dot(h2d, w_out_ref[...], preferred_element_type=jnp.float32)
         + b_out_ref[...])
    out_ref[...] = y.reshape(tt, tb, Op).astype(out_ref.dtype)


# ---------------------------------------------------------------------------
# Wrapper
# ---------------------------------------------------------------------------
def _round_up(n, m):
    return ((n + m - 1) // m) * m


def _pad_to(a, shape):
    return jnp.pad(a, [(0, s - d) for s, d in zip(shape, a.shape)])


def rnn_model_forward(x, params, *, time_chunk=8, compute_dtype=jnp.float32):
    """x: (B, T, input_dim) batch-first, like the PyTorch module.

    compute_dtype: dtype of the MXU operands (weights / activations). Use
    jnp.bfloat16 on v5e/v6e/v7x for throughput; accumulation stays f32.
    """
    B, T, D = x.shape
    H = params["w_hh_t"].shape[0]
    O = params["w_out_t"].shape[1]

    # TPU-friendly padded shapes (zeros are exact for the real output slice).
    if B <= 128:
        Bp = _round_up(B, 8)
        tb = Bp
    else:
        Bp = _round_up(B, 128)
        tb = 128
    Dp = _round_up(D, 128)
    Hp = _round_up(H, 128)
    Op = _round_up(O, 128)
    tt = min(time_chunk, T)
    Tp = _round_up(T, tt)

    # Time-major + pad (one fused XLA copy; padding already requires a copy, so
    # the transpose is effectively free here).
    x_tm = jnp.transpose(x, (1, 0, 2))                              # (T, B, D)
    x_tm = _pad_to(x_tm, (Tp, Bp, Dp)).astype(compute_dtype)

    w_ih = _pad_to(params["w_ih_t"], (Dp, Hp)).astype(compute_dtype)
    w_hh = _pad_to(params["w_hh_t"], (Hp, Hp)).astype(compute_dtype)
    w_out = _pad_to(params["w_out_t"], (Hp, Op)).astype(compute_dtype)
    b = _pad_to((params["b_ih"] + params["b_hh"]).astype(jnp.float32), (1, Hp))
    b_out = _pad_to(params["b_out"].astype(jnp.float32), (1, Op))

    grid = (Bp // tb, Tp // tt)

    wbytes = jnp.dtype(compute_dtype).itemsize
    cost = pl.CostEstimate(
        flops=2 * Tp * Bp * (Dp * Hp + Hp * Hp + Hp * Op),
        transcendentals=Tp * Bp * Hp,
        bytes_accessed=(Tp * Bp * Dp * wbytes + Tp * Bp * Op * 4
                        + (Dp * Hp + Hp * Hp + Hp * Op) * wbytes),
    )

    out_tm = pl.pallas_call(
        rnn_chunk_kernel,
        out_shape=jax.ShapeDtypeStruct((Tp, Bp, Op), jnp.float32),
        grid=grid,
        in_specs=[
            pl.BlockSpec((tt, tb, Dp), lambda b, t: (t, b, 0)),   # x (time-major)
            pl.BlockSpec((Dp, Hp), lambda b, t: (0, 0)),          # W_ih^T
            pl.BlockSpec((1, Hp), lambda b, t: (0, 0)),           # b_ih + b_hh
            pl.BlockSpec((Hp, Hp), lambda b, t: (0, 0)),          # W_hh^T
            pl.BlockSpec((Hp, Op), lambda b, t: (0, 0)),          # W_out^T
            pl.BlockSpec((1, Op), lambda b, t: (0, 0)),           # b_out
        ],
        out_specs=pl.BlockSpec((tt, tb, Op), lambda b, t: (t, b, 0)),
        scratch_shapes=[
            pltpu.VMEM((tb, Hp), jnp.float32),       # carried hidden state
            pltpu.VMEM((tt, tb, Hp), jnp.float32),   # per-chunk proj/hidden buffer
        ],
        compiler_params=pltpu.CompilerParams(
            dimension_semantics=("parallel", "arbitrary")),
        cost_estimate=cost,
    )(x_tm, w_ih, b, w_hh, w_out, b_out)

    # Strip padding, back to batch-first.
    return jnp.transpose(out_tm[:T, :B, :O], (1, 0, 2))            # (B, T, O)


# ---------------------------------------------------------------------------
# Params + pure-JAX reference (PyTorch semantics)
# ---------------------------------------------------------------------------
def init_params(key, input_dim, hidden_dim, output_dim):
    """Deterministic init mimicking PyTorch's U(-1/sqrt(H), 1/sqrt(H))."""
    ks = jax.random.split(key, 6)
    bound = 1.0 / jnp.sqrt(hidden_dim)
    u = lambda k, shape: jax.random.uniform(k, shape, jnp.float32, -bound, bound)
    return {
        "w_ih_t":  u(ks[0], (input_dim, hidden_dim)),    # W_ih^T
        "b_ih":    u(ks[1], (1, hidden_dim)),
        "w_hh_t":  u(ks[2], (hidden_dim, hidden_dim)),   # W_hh^T
        "b_hh":    u(ks[3], (1, hidden_dim)),
        "w_out_t": u(ks[4], (hidden_dim, output_dim)),   # W_linear^T
        "b_out":   u(ks[5], (1, output_dim)),
    }


def reference_forward(x, p):
    """Pure-JAX reference of the PyTorch forward (lax.scan over time)."""
    B, T, D = x.shape
    H = p["w_hh_t"].shape[0]
    h0 = jnp.zeros((B, H), jnp.float32)

    def step(h, x_t):
        h_new = jnp.tanh(x_t @ p["w_ih_t"] + p["b_ih"]
                         + h @ p["w_hh_t"] + p["b_hh"])
        return h_new, h_new

    _, hs = lax.scan(step, h0, jnp.transpose(x, (1, 0, 2)))   # (T, B, H)
    ys = hs @ p["w_out_t"] + p["b_out"]                        # (T, B, O)
    return jnp.transpose(ys, (1, 0, 2))


# ---------------------------------------------------------------------------
if __name__ == "__main__":
    B, T = 2, 8
    input_dim, hidden_dim, output_dim = 16, 32, 8

    key = jax.random.PRNGKey(0)
    k_x, k_p = jax.random.split(key)
    x = jax.random.normal(k_x, (B, T, input_dim), jnp.float32)
    params = init_params(k_p, input_dim, hidden_dim, output_dim)

    ref = reference_forward(x, params)

    # f32 path: matches the PyTorch module numerics.
    fwd_f32 = jax.jit(rnn_model_forward)
    out = jax.block_until_ready(fwd_f32(x, params))
    assert out.shape == (B, T, output_dim)
    err = float(jnp.max(jnp.abs(out - ref)))
    assert jnp.allclose(out, ref, atol=1e-4, rtol=1e-4), f"f32 max err {err}"

    # bf16 MXU-operand path (recommended on v5e/v6e/v7x); f32 accumulation.
    fwd_bf16 = jax.jit(lambda xx, pp: rnn_model_forward(
        xx, pp, compute_dtype=jnp.bfloat16))
    out_bf16 = jax.block_until_ready(fwd_bf16(x, params))
    err_bf16 = float(jnp.max(jnp.abs(out_bf16 - ref)))
    assert jnp.allclose(out_bf16, ref, atol=1e-1, rtol=1e-1), \
        f"bf16 max err {err_bf16}"

    print("KERNEL_OK")
</pallas_src>

<mosaic_0001>
module attributes {stable_mosaic.version = 11 : i64} {
  func.func @rnn_chunk_kernel(%arg0: i32, %arg1: i32, %arg2: memref<8x8x128xf32, #tpu.memory_space<vmem>>, %arg3: memref<128x128xf32, #tpu.memory_space<vmem>>, %arg4: memref<1x128xf32, #tpu.memory_space<vmem>>, %arg5: memref<128x128xf32, #tpu.memory_space<vmem>>, %arg6: memref<128x128xf32, #tpu.memory_space<vmem>>, %arg7: memref<1x128xf32, #tpu.memory_space<vmem>>, %arg8: memref<8x8x128xf32, #tpu.memory_space<vmem>>, %arg9: memref<8x128xf32, #tpu.memory_space<vmem>>, %arg10: memref<8x8x128xf32, #tpu.memory_space<vmem>>) attributes {dimension_semantics = [#tpu.dimension_semantics<parallel>, #tpu.dimension_semantics<arbitrary>], iteration_bounds = array<i64: 1, 1>, scalar_prefetch = 0 : i64, scratch_operands = 2 : i64, tpu.core_type = #tpu.core_type<tc>, window_params = [{transform_indices = @transform_0, window_bounds = array<i64: 8, 8, 128>}, {pipeline_mode = #tpu.pipeline_mode<synchronous>, transform_indices = @transform_1, window_bounds = array<i64: 128, 128>}, {pipeline_mode = #tpu.pipeline_mode<synchronous>, transform_indices = @transform_2, window_bounds = array<i64: 1, 128>}, {pipeline_mode = #tpu.pipeline_mode<synchronous>, transform_indices = @transform_3, window_bounds = array<i64: 128, 128>}, {pipeline_mode = #tpu.pipeline_mode<synchronous>, transform_indices = @transform_4, window_bounds = array<i64: 128, 128>}, {pipeline_mode = #tpu.pipeline_mode<synchronous>, transform_indices = @transform_5, window_bounds = array<i64: 1, 128>}, {transform_indices = @transform_6, window_bounds = array<i64: 8, 8, 128>}]} {
    %c0_i32 = arith.constant 0 : i32
    %0 = arith.cmpi eq, %arg1, %c0_i32 : i32
    %1 = arith.extui %0 : i1 to i32
    %c0_i32_0 = arith.constant 0 : i32
    %2 = arith.cmpi ne, %1, %c0_i32_0 : i32
    scf.if %2 {
      %cst_76 = arith.constant 0.000000e+00 : f32
      %88 = vector.broadcast %cst_76 : f32 to vector<8x128xf32>
      %c0_77 = arith.constant 0 : index
      %c0_78 = arith.constant 0 : index
      %89 = vector.load %arg9[%c0_77, %c0_78] : memref<8x128xf32, #tpu.memory_space<vmem>>, vector<8x128xf32>
      tpu.vector_store %arg9[%c0_77, %c0_78], %88 {strides = array<i32>} : memref<8x128xf32, #tpu.memory_space<vmem>>, vector<8x128xf32>,
    } else {
    }
    %c0 = arith.constant 0 : index
    %c0_1 = arith.constant 0 : index
    %c0_2 = arith.constant 0 : index
    %3 = vector.load %arg2[%c0, %c0_1, %c0_2] : memref<8x8x128xf32, #tpu.memory_space<vmem>>, vector<8x8x128xf32>
    %4 = vector.shape_cast %3 : vector<8x8x128xf32> to vector<64x128xf32>
    %c0_3 = arith.constant 0 : index
    %c0_4 = arith.constant 0 : index
    %5 = vector.load %arg3[%c0_3, %c0_4] : memref<128x128xf32, #tpu.memory_space<vmem>>, vector<128x128xf32>
    %cst = arith.constant dense<0.000000e+00> : vector<64x128xf32>
    %6 = tpu.matmul %4, %5, %cst {dimension_numbers = #tpu.dot_dimension_numbers<[1], [0], [0], [1], [0, 0, 1, 1], [], []>} : vector<64x128xf32>, vector<128x128xf32>, vector<64x128xf32> -> vector<64x128xf32>
    %c0_5 = arith.constant 0 : index
    %c0_6 = arith.constant 0 : index
    %7 = vector.load %arg4[%c0_5, %c0_6] : memref<1x128xf32, #tpu.memory_space<vmem>>, vector<1x128xf32>
    %8 = vector.broadcast %7 : vector<1x128xf32> to vector<64x128xf32>
    %9 = arith.addf %6, %8 : vector<64x128xf32>
    %10 = vector.shape_cast %9 : vector<64x128xf32> to vector<8x8x128xf32>
    %c0_7 = arith.constant 0 : index
    %c0_8 = arith.constant 0 : index
    %c0_9 = arith.constant 0 : index
    %11 = vector.load %arg10[%c0_7, %c0_8, %c0_9] : memref<8x8x128xf32, #tpu.memory_space<vmem>>, vector<8x8x128xf32>
    tpu.vector_store %arg10[%c0_7, %c0_8, %c0_9], %10 {strides = array<i32>} : memref<8x8x128xf32, #tpu.memory_space<vmem>>, vector<8x8x128xf32>,
    %c0_10 = arith.constant 0 : index
    %c0_11 = arith.constant 0 : index
    %12 = vector.load %arg5[%c0_10, %c0_11] : memref<128x128xf32, #tpu.memory_space<vmem>>, vector<128x128xf32>
    %c0_12 = arith.constant 0 : index
    %c0_13 = arith.constant 0 : index
    %13 = vector.load %arg9[%c0_12, %c0_13] : memref<8x128xf32, #tpu.memory_space<vmem>>, vector<8x128xf32>
    %c0_14 = arith.constant 0 : index
    %c0_15 = arith.constant 0 : index
    %c0_16 = arith.constant 0 : index
    %14 = vector.load %arg10[%c0_14, %c0_15, %c0_16] : memref<8x8x128xf32, #tpu.memory_space<vmem>>, vector<1x8x128xf32>
    %15 = vector.shape_cast %14 : vector<1x8x128xf32> to vector<8x128xf32>
    %cst_17 = arith.constant dense<0.000000e+00> : vector<8x128xf32>
    %16 = tpu.matmul %13, %12, %cst_17 {dimension_numbers = #tpu.dot_dimension_numbers<[1], [0], [0], [1], [0, 0, 1, 1], [], []>} : vector<8x128xf32>, vector<128x128xf32>, vector<8x128xf32> -> vector<8x128xf32>
    %17 = arith.addf %15, %16 : vector<8x128xf32>
    %18 = math.tanh %17 : vector<8x128xf32>
    %c0_18 = arith.constant 0 : index
    %c0_19 = arith.constant 0 : index
    %c0_20 = arith.constant 0 : index
    %19 = vector.load %arg10[%c0_18, %c0_19, %c0_20] : memref<8x8x128xf32, #tpu.memory_space<vmem>>, vector<1x8x128xf32>
    %20 = vector.shape_cast %19 : vector<1x8x128xf32> to vector<8x128xf32>
    %21 = vector.shape_cast %18 : vector<8x128xf32> to vector<1x8x128xf32>
    tpu.vector_store %arg10[%c0_18, %c0_19, %c0_20], %21 {strides = array<i32>} : memref<8x8x128xf32, #tpu.memory_space<vmem>>, vector<1x8x128xf32>,
    %c1 = arith.constant 1 : index
    %c0_21 = arith.constant 0 : index
    %c0_22 = arith.constant 0 : index
    %22 = vector.load %arg10[%c1, %c0_21, %c0_22] : memref<8x8x128xf32, #tpu.memory_space<vmem>>, vector<1x8x128xf32>
    %23 = vector.shape_cast %22 : vector<1x8x128xf32> to vector<8x128xf32>
    %cst_23 = arith.constant dense<0.000000e+00> : vector<8x128xf32>
    %24 = tpu.matmul %18, %12, %cst_23 {dimension_numbers = #tpu.dot_dimension_numbers<[1], [0], [0], [1], [0, 0, 1, 1], [], []>} : vector<8x128xf32>, vector<128x128xf32>, vector<8x128xf32> -> vector<8x128xf32>
    %25 = arith.addf %23, %24 : vector<8x128xf32>
    %26 = math.tanh %25 : vector<8x128xf32>
    %c1_24 = arith.constant 1 : index
    %c0_25 = arith.constant 0 : index
    %c0_26 = arith.constant 0 : index
    %27 = vector.load %arg10[%c1_24, %c0_25, %c0_26] : memref<8x8x128xf32, #tpu.memory_space<vmem>>, vector<1x8x128xf32>
    %28 = vector.shape_cast %27 : vector<1x8x128xf32> to vector<8x128xf32>
    %29 = vector.shape_cast %26 : vector<8x128xf32> to vector<1x8x128xf32>
    tpu.vector_store %arg10[%c1_24, %c0_25, %c0_26], %29 {strides = array<i32>} : memref<8x8x128xf32, #tpu.memory_space<vmem>>, vector<1x8x128xf32>,
    %c2 = arith.constant 2 : index
    %c0_27 = arith.constant 0 : index
    %c0_28 = arith.constant 0 : index
    %30 = vector.load %arg10[%c2, %c0_27, %c0_28] : memref<8x8x128xf32, #tpu.memory_space<vmem>>, vector<1x8x128xf32>
    %31 = vector.shape_cast %30 : vector<1x8x128xf32> to vector<8x128xf32>
    %cst_29 = arith.constant dense<0.000000e+00> : vector<8x128xf32>
    %32 = tpu.matmul %26, %12, %cst_29 {dimension_numbers = #tpu.dot_dimension_numbers<[1], [0], [0], [1], [0, 0, 1, 1], [], []>} : vector<8x128xf32>, vector<128x128xf32>, vector<8x128xf32> -> vector<8x128xf32>
    %33 = arith.addf %31, %32 : vector<8x128xf32>
    %34 = math.tanh %33 : vector<8x128xf32>
    %c2_30 = arith.constant 2 : index
    %c0_31 = arith.constant 0 : index
    %c0_32 = arith.constant 0 : index
    %35 = vector.load %arg10[%c2_30, %c0_31, %c0_32] : memref<8x8x128xf32, #tpu.memory_space<vmem>>, vector<1x8x128xf32>
    %36 = vector.shape_cast %35 : vector<1x8x128xf32> to vector<8x128xf32>
    %37 = vector.shape_cast %34 : vector<8x128xf32> to vector<1x8x128xf32>
    tpu.vector_store %arg10[%c2_30, %c0_31, %c0_32], %37 {strides = array<i32>} : memref<8x8x128xf32, #tpu.memory_space<vmem>>, vector<1x8x128xf32>,
    %c3 = arith.constant 3 : index
    %c0_33 = arith.constant 0 : index
    %c0_34 = arith.constant 0 : index
    %38 = vector.load %arg10[%c3, %c0_33, %c0_34] : memref<8x8x128xf32, #tpu.memory_space<vmem>>, vector<1x8x128xf32>
    %39 = vector.shape_cast %38 : vector<1x8x128xf32> to vector<8x128xf32>
    %cst_35 = arith.constant dense<0.000000e+00> : vector<8x128xf32>
    %40 = tpu.matmul %34, %12, %cst_35 {dimension_numbers = #tpu.dot_dimension_numbers<[1], [0], [0], [1], [0, 0, 1, 1], [], []>} : vector<8x128xf32>, vector<128x128xf32>, vector<8x128xf32> -> vector<8x128xf32>
    %41 = arith.addf %39, %40 : vector<8x128xf32>
    %42 = math.tanh %41 : vector<8x128xf32>
    %c3_36 = arith.constant 3 : index
    %c0_37 = arith.constant 0 : index
    %c0_38 = arith.constant 0 : index
    %43 = vector.load %arg10[%c3_36, %c0_37, %c0_38] : memref<8x8x128xf32, #tpu.memory_space<vmem>>, vector<1x8x128xf32>
    %44 = vector.shape_cast %43 : vector<1x8x128xf32> to vector<8x128xf32>
    %45 = vector.shape_cast %42 : vector<8x128xf32> to vector<1x8x128xf32>
    tpu.vector_store %arg10[%c3_36, %c0_37, %c0_38], %45 {strides = array<i32>} : memref<8x8x128xf32, #tpu.memory_space<vmem>>, vector<1x8x128xf32>,
    %c4 = arith.constant 4 : index
    %c0_39 = arith.constant 0 : index
    %c0_40 = arith.constant 0 : index
    %46 = vector.load %arg10[%c4, %c0_39, %c0_40] : memref<8x8x128xf32, #tpu.memory_space<vmem>>, vector<1x8x128xf32>
    %47 = vector.shape_cast %46 : vector<1x8x128xf32> to vector<8x128xf32>
    %cst_41 = arith.constant dense<0.000000e+00> : vector<8x128xf32>
    %48 = tpu.matmul %42, %12, %cst_41 {dimension_numbers = #tpu.dot_dimension_numbers<[1], [0], [0], [1], [0, 0, 1, 1], [], []>} : vector<8x128xf32>, vector<128x128xf32>, vector<8x128xf32> -> vector<8x128xf32>
    %49 = arith.addf %47, %48 : vector<8x128xf32>
    %50 = math.tanh %49 : vector<8x128xf32>
    %c4_42 = arith.constant 4 : index
    %c0_43 = arith.constant 0 : index
    %c0_44 = arith.constant 0 : index
    %51 = vector.load %arg10[%c4_42, %c0_43, %c0_44] : memref<8x8x128xf32, #tpu.memory_space<vmem>>, vector<1x8x128xf32>
    %52 = vector.shape_cast %51 : vector<1x8x128xf32> to vector<8x128xf32>
    %53 = vector.shape_cast %50 : vector<8x128xf32> to vector<1x8x128xf32>
    tpu.vector_store %arg10[%c4_42, %c0_43, %c0_44], %53 {strides = array<i32>} : memref<8x8x128xf32, #tpu.memory_space<vmem>>, vector<1x8x128xf32>,
    %c5 = arith.constant 5 : index
    %c0_45 = arith.constant 0 : index
    %c0_46 = arith.constant 0 : index
    %54 = vector.load %arg10[%c5, %c0_45, %c0_46] : memref<8x8x128xf32, #tpu.memory_space<vmem>>, vector<1x8x128xf32>
    %55 = vector.shape_cast %54 : vector<1x8x128xf32> to vector<8x128xf32>
    %cst_47 = arith.constant dense<0.000000e+00> : vector<8x128xf32>
    %56 = tpu.matmul %50, %12, %cst_47 {dimension_numbers = #tpu.dot_dimension_numbers<[1], [0], [0], [1], [0, 0, 1, 1], [], []>} : vector<8x128xf32>, vector<128x128xf32>, vector<8x128xf32> -> vector<8x128xf32>
    %57 = arith.addf %55, %56 : vector<8x128xf32>
    %58 = math.tanh %57 : vector<8x128xf32>
    %c5_48 = arith.constant 5 : index
    %c0_49 = arith.constant 0 : index
    %c0_50 = arith.constant 0 : index
    %59 = vector.load %arg10[%c5_48, %c0_49, %c0_50] : memref<8x8x128xf32, #tpu.memory_space<vmem>>, vector<1x8x128xf32>
    %60 = vector.shape_cast %59 : vector<1x8x128xf32> to vector<8x128xf32>
    %61 = vector.shape_cast %58 : vector<8x128xf32> to vector<1x8x128xf32>
    tpu.vector_store %arg10[%c5_48, %c0_49, %c0_50], %61 {strides = array<i32>} : memref<8x8x128xf32, #tpu.memory_space<vmem>>, vector<1x8x128xf32>,
    %c6 = arith.constant 6 : index
    %c0_51 = arith.constant 0 : index
    %c0_52 = arith.constant 0 : index
    %62 = vector.load %arg10[%c6, %c0_51, %c0_52] : memref<8x8x128xf32, #tpu.memory_space<vmem>>, vector<1x8x128xf32>
    %63 = vector.shape_cast %62 : vector<1x8x128xf32> to vector<8x128xf32>
    %cst_53 = arith.constant dense<0.000000e+00> : vector<8x128xf32>
    %64 = tpu.matmul %58, %12, %cst_53 {dimension_numbers = #tpu.dot_dimension_numbers<[1], [0], [0], [1], [0, 0, 1, 1], [], []>} : vector<8x128xf32>, vector<128x128xf32>, vector<8x128xf32> -> vector<8x128xf32>
    %65 = arith.addf %63, %64 : vector<8x128xf32>
    %66 = math.tanh %65 : vector<8x128xf32>
    %c6_54 = arith.constant 6 : index
    %c0_55 = arith.constant 0 : index
    %c0_56 = arith.constant 0 : index
    %67 = vector.load %arg10[%c6_54, %c0_55, %c0_56] : memref<8x8x128xf32, #tpu.memory_space<vmem>>, vector<1x8x128xf32>
    %68 = vector.shape_cast %67 : vector<1x8x128xf32> to vector<8x128xf32>
    %69 = vector.shape_cast %66 : vector<8x128xf32> to vector<1x8x128xf32>
    tpu.vector_store %arg10[%c6_54, %c0_55, %c0_56], %69 {strides = array<i32>} : memref<8x8x128xf32, #tpu.memory_space<vmem>>, vector<1x8x128xf32>,
    %c7 = arith.constant 7 : index
    %c0_57 = arith.constant 0 : index
    %c0_58 = arith.constant 0 : index
    %70 = vector.load %arg10[%c7, %c0_57, %c0_58] : memref<8x8x128xf32, #tpu.memory_space<vmem>>, vector<1x8x128xf32>
    %71 = vector.shape_cast %70 : vector<1x8x128xf32> to vector<8x128xf32>
    %cst_59 = arith.constant dense<0.000000e+00> : vector<8x128xf32>
    %72 = tpu.matmul %66, %12, %cst_59 {dimension_numbers = #tpu.dot_dimension_numbers<[1], [0], [0], [1], [0, 0, 1, 1], [], []>} : vector<8x128xf32>, vector<128x128xf32>, vector<8x128xf32> -> vector<8x128xf32>
    %73 = arith.addf %71, %72 : vector<8x128xf32>
    %74 = math.tanh %73 : vector<8x128xf32>
    %c7_60 = arith.constant 7 : index
    %c0_61 = arith.constant 0 : index
    %c0_62 = arith.constant 0 : index
    %75 = vector.load %arg10[%c7_60, %c0_61, %c0_62] : memref<8x8x128xf32, #tpu.memory_space<vmem>>, vector<1x8x128xf32>
    %76 = vector.shape_cast %75 : vector<1x8x128xf32> to vector<8x128xf32>
    %77 = vector.shape_cast %74 : vector<8x128xf32> to vector<1x8x128xf32>
    tpu.vector_store %arg10[%c7_60, %c0_61, %c0_62], %77 {strides = array<i32>} : memref<8x8x128xf32, #tpu.memory_space<vmem>>, vector<1x8x128xf32>,
    %c0_63 = arith.constant 0 : index
    %c0_64 = arith.constant 0 : index
    %78 = vector.load %arg9[%c0_63, %c0_64] : memref<8x128xf32, #tpu.memory_space<vmem>>, vector<8x128xf32>
    tpu.vector_store %arg9[%c0_63, %c0_64], %74 {strides = array<i32>} : memref<8x128xf32, #tpu.memory_space<vmem>>, vector<8x128xf32>,
    %c0_65 = arith.constant 0 : index
    %c0_66 = arith.constant 0 : index
    %c0_67 = arith.constant 0 : index
    %79 = vector.load %arg10[%c0_65, %c0_66, %c0_67] : memref<8x8x128xf32, #tpu.memory_space<vmem>>, vector<8x8x128xf32>
    %80 = vector.shape_cast %79 : vector<8x8x128xf32> to vector<64x128xf32>
    %c0_68 = arith.constant 0 : index
    %c0_69 = arith.constant 0 : index
    %81 = vector.load %arg6[%c0_68, %c0_69] : memref<128x128xf32, #tpu.memory_space<vmem>>, vector<128x128xf32>
    %cst_70 = arith.constant dense<0.000000e+00> : vector<64x128xf32>
    %82 = tpu.matmul %80, %81, %cst_70 {dimension_numbers = #tpu.dot_dimension_numbers<[1], [0], [0], [1], [0, 0, 1, 1], [], []>} : vector<64x128xf32>, vector<128x128xf32>, vector<64x128xf32> -> vector<64x128xf32>
    %c0_71 = arith.constant 0 : index
    %c0_72 = arith.constant 0 : index
    %83 = vector.load %arg7[%c0_71, %c0_72] : memref<1x128xf32, #tpu.memory_space<vmem>>, vector<1x128xf32>
    %84 = vector.broadcast %83 : vector<1x128xf32> to vector<64x128xf32>
    %85 = arith.addf %82, %84 : vector<64x128xf32>
    %86 = vector.shape_cast %85 : vector<64x128xf32> to vector<8x8x128xf32>
    %c0_73 = arith.constant 0 : index
    %c0_74 = arith.constant 0 : index
    %c0_75 = arith.constant 0 : index
    %87 = vector.load %arg8[%c0_73, %c0_74, %c0_75] : memref<8x8x128xf32, #tpu.memory_space<vmem>>, vector<8x8x128xf32>
    tpu.vector_store %arg8[%c0_73, %c0_74, %c0_75], %86 {strides = array<i32>} : memref<8x8x128xf32, #tpu.memory_space<vmem>>, vector<8x8x128xf32>,
    return
  }
  func.func @transform_0(%arg0: i32, %arg1: i32) -> (i32, i32, i32) {
    %c0_i32 = arith.constant 0 : i32
    %c0_i32_0 = arith.constant 0 : i32
    return %arg1, %arg0, %c0_i32 : i32, i32, i32
  }
  func.func @transform_1(%arg0: i32, %arg1: i32) -> (i32, i32) {
    %c0_i32 = arith.constant 0 : i32
    %c0_i32_0 = arith.constant 0 : i32
    %c0_i32_1 = arith.constant 0 : i32
    return %c0_i32, %c0_i32_0 : i32, i32
  }
  func.func @transform_2(%arg0: i32, %arg1: i32) -> (i32, i32) {
    %c0_i32 = arith.constant 0 : i32
    %c0_i32_0 = arith.constant 0 : i32
    %c0_i32_1 = arith.constant 0 : i32
    return %c0_i32, %c0_i32_0 : i32, i32
  }
  func.func @transform_3(%arg0: i32, %arg1: i32) -> (i32, i32) {
    %c0_i32 = arith.constant 0 : i32
    %c0_i32_0 = arith.constant 0 : i32
    %c0_i32_1 = arith.constant 0 : i32
    return %c0_i32, %c0_i32_0 : i32, i32
  }
  func.func @transform_4(%arg0: i32, %arg1: i32) -> (i32, i32) {
    %c0_i32 = arith.constant 0 : i32
    %c0_i32_0 = arith.constant 0 : i32
    %c0_i32_1 = arith.constant 0 : i32
    return %c0_i32, %c0_i32_0 : i32, i32
  }
  func.func @transform_5(%arg0: i32, %arg1: i32) -> (i32, i32) {
    %c0_i32 = arith.constant 0 : i32
    %c0_i32_0 = arith.constant 0 : i32
    %c0_i32_1 = arith.constant 0 : i32
    return %c0_i32, %c0_i32_0 : i32, i32
  }
  func.func @transform_6(%arg0: i32, %arg1: i32) -> (i32, i32, i32) {
    %c0_i32 = arith.constant 0 : i32
    %c0_i32_0 = arith.constant 0 : i32
    return %arg1, %arg0, %c0_i32 : i32, i32, i32
  }
}

</mosaic_0001>

<bundles_post_ra>
// kernel: rnn_model_forward.1
= control target key start
LH: loop header
LB: loop body
LE: loop exit
PB: predicated region body
PF: predicated region fallthrough
CT: control target
= control target key end

     0   :  { %v1766_v2 = vmov 0.0|0.0   ;;  %vm1767_vm0 = vmmov 0   ;;  %v1768_v4 = vmov 0.0   ;;  %s2205_s1 = inlined_call_operand.vmem [shape: f32[128,128], index: 1, kind: input, shape index: {}]   ;;  %s2206_s3 = inlined_call_operand.vmem [shape: f32[128,128], index: 3, kind: input, shape index: {}]   ;;  %s2207_s0 = inlined_call_operand.vmem [shape: f32[8,8,128], index: 0, kind: input, shape index: {}]   ;;  %s2208_s2 = inlined_call_operand.vmem [shape: f32[1,128], index: 2, kind: input, shape index: {}]   ;;  %s2209_s4 = inlined_call_operand.vmem [shape: f32[128,128], index: 4, kind: input, shape index: {}]   ;;  %s2210_s5 = inlined_call_operand.vmem [shape: f32[1,128], index: 5, kind: input, shape index: {}]   ;;  %s2211_s6 = inlined_call_operand.vmem [shape: f32[8,8,128], index: 6, kind: output, shape index: {}]  }
   0x1   :  { %v36_v0 = vld [vmem:[%s2205_s1] sm:$0xff]  ;;  %v37_v1 = vld [vmem:[%s2205_s1 + $0x8] sm:$0xff]  ;;  %1523 = vmatprep.subr.bf16.mxu1 %v1766_v2  ;;  %1199 = vmatprep.mubr.msk.f32.mxu1 %vm1767_vm0, %v1768_v4  ;;  %v38_v7 = vld [vmem:[%s2205_s1 + $0x10] sm:$0xff] }
   0x2   :  { %v172_v3 = vld [vmem:[%s2206_s3] sm:$0xff]  ;;  %v1491_v5 = vpack.c.bf16 %v37_v1, %v36_v0  ;;  %v173_v6 = vld [vmem:[%s2206_s3 + $0x8] sm:$0xff]  ;;  %v39_v8 = vld [vmem:[%s2205_s1 + $0x18] sm:$0xff] }
   0x3   :  { %v1825_v9 = vpack.c.bf16 %v173_v6, %v172_v3  ;;  %v1495_v10 = vpack.c.bf16 %v39_v8, %v38_v7  ;;  %v174_v11 = vld [vmem:[%s2206_s3 + $0x10] sm:$0xff]  ;;  %v175_v12 = vld [vmem:[%s2206_s3 + $0x18] sm:$0xff]  ;;  %v40_v13 = vld [vmem:[%s2205_s1 + $0x20] sm:$0xff] }
   0x4   :  { %1492 = vmatprep.subr.bf16.mxu0 %v1491_v5  ;;  %v41_v14 = vld [vmem:[%s2205_s1 + $0x28] sm:$0xff]  ;;  %v1840_v15 = vpack.c.bf16 %v175_v12, %v174_v11  ;;  %v176_v17 = vld [vmem:[%s2206_s3 + $0x20] sm:$0xff]  ;;  %v42_v19 = vld [vmem:[%s2205_s1 + $0x30] sm:$0xff] }
   0x5   :  { %1494 = vmatpush3.bf16.msra.mxu0 %v1491_v5  ;;  %1525 = vmatpush3.bf16.msra.mxu1 %v1825_v9  ;;  %v1499_v16 = vpack.c.bf16 %v41_v14, %v40_v13  ;;  %v177_v18 = vld [vmem:[%s2206_s3 + $0x28] sm:$0xff]  ;;  %v43_v20 = vld [vmem:[%s2205_s1 + $0x38] sm:$0xff]  ;;  %v178_v23 = vld [vmem:[%s2206_s3 + $0x30] sm:$0xff] }
   0x6   :  { %1496 = vmatprep.subr.bf16.mxu0 %v1495_v10  ;;  %1526 = vmatprep.subr.bf16.mxu1 %v1766_v2  ;;  %v1856_v21 = vpack.c.bf16 %v177_v18, %v176_v17  ;;  %v1503_v22 = vpack.c.bf16 %v43_v20, %v42_v19  ;;  %v179_v24 = vld [vmem:[%s2206_s3 + $0x38] sm:$0xff]  ;;  %v44_v25 = vld [vmem:[%s2205_s1 + $0x40] sm:$0xff]  ;;  %v45_v26 = vld [vmem:[%s2205_s1 + $0x48] sm:$0xff] }
   0x7   :  { %v28_v27 = vld [vmem:[%s2207_s0] sm:$0xff]  ;;  %v1875_v28 = vpack.c.bf16 %v179_v24, %v178_v23  ;;  %v1507_v29 = vpack.c.bf16 %v45_v26, %v44_v25  ;;  %v181_v31 = vld [vmem:[%s2206_s3 + $0x48] sm:$0xff]  ;;  %v46_v32 = vld [vmem:[%s2205_s1 + $0x50] sm:$0xff] }
   0x8   :  { %1155 = vmatprep.mubr.f32.mxu0 %v28_v27  ;;  %v180_v30 = vld [vmem:[%s2206_s3 + $0x40] sm:$0xff]  ;;  %v47_v33 = vld [vmem:[%s2205_s1 + $0x58] sm:$0xff]  ;;  %v182_v36 = vld [vmem:[%s2206_s3 + $0x50] sm:$0xff] }
   0x9   :  { %1498 = vmatpush3.bf16.msra.mxu0 %v1495_v10  ;;  %1528 = vmatpush3.bf16.msra.mxu1 %v1840_v15  ;;  %v1891_v34 = vpack.c.bf16 %v181_v31, %v180_v30  ;;  %v1511_v35 = vpack.c.bf16 %v47_v33, %v46_v32  ;;  %v183_v37 = vld [vmem:[%s2206_s3 + $0x58] sm:$0xff]  ;;  %v48_v38 = vld [vmem:[%s2205_s1 + $0x60] sm:$0xff]  ;;  %v49_v39 = vld [vmem:[%s2205_s1 + $0x68] sm:$0xff] }
   0xa   :  { %1500 = vmatprep.subr.bf16.mxu0 %v1499_v16  ;;  %1529 = vmatprep.subr.bf16.mxu1 %v1766_v2  ;;  %v1907_v40 = vpack.c.bf16 %v183_v37, %v182_v36  ;;  %v1515_v41 = vpack.c.bf16 %v49_v39, %v48_v38  ;;  %v184_v42 = vld [vmem:[%s2206_s3 + $0x60] sm:$0xff]  ;;  %v185_v43 = vld [vmem:[%s2206_s3 + $0x68] sm:$0xff]  ;;  %v50_v44 = vld [vmem:[%s2205_s1 + $0x70] sm:$0xff] }
   0xb   :  { %v51_v45 = vld [vmem:[%s2205_s1 + $0x78] sm:$0xff]  ;;  %v1923_v46 = vpack.c.bf16 %v185_v43, %v184_v42  ;;  %v186_v48 = vld [vmem:[%s2206_s3 + $0x70] sm:$0xff]  ;;  %v29_v51 = vld [vmem:[%s2207_s0 + $0x8] sm:$0xff] }
   0xc   :  { %v1519_v47 = vpack.c.bf16 %v51_v45, %v50_v44  ;;  %v187_v49 = vld [vmem:[%s2206_s3 + $0x78] sm:$0xff]  ;;  %v30_v52 = vld [vmem:[%s2207_s0 + $0x10] sm:$0xff]  ;;  %v32_v54 = vld [vmem:[%s2207_s0 + $0x20] sm:$0xff] }
   0xd   :  { %1502 = vmatpush3.bf16.msra.mxu0 %v1499_v16  ;;  %1531 = vmatpush3.bf16.msra.mxu1 %v1856_v21  ;;  %v1933_v50 = vpack.c.bf16 %v187_v49, %v186_v48  ;;  %v31_v53 = vld [vmem:[%s2207_s0 + $0x18] sm:$0xff]  ;;  %v33_v55 = vld [vmem:[%s2207_s0 + $0x28] sm:$0xff]  ;;  %v34_v56 = vld [vmem:[%s2207_s0 + $0x30] sm:$0xff] }
   0xe   :  { %1504 = vmatprep.subr.bf16.mxu0 %v1503_v22  ;;  %1532 = vmatprep.subr.bf16.mxu1 %v1766_v2  ;;  %v35_v57 = vld [vmem:[%s2207_s0 + $0x38] sm:$0xff]  ;;  %v2000_v58 = vld [vmem:[%s2208_s2] ss:$0 sm:$0xff]  ;;  %v803_v42 = vld [vmem:[%s2209_s4 + $0x30] sm:$0xff] }
   0xf   :  { %v800_v36 = vld [vmem:[%s2209_s4 + $0x18] sm:$0xff]  ;;  %v801_v39 = vld [vmem:[%s2209_s4 + $0x20] sm:$0xff]  ;;  %v807_v48 = vld [vmem:[%s2209_s4 + $0x50] sm:$0xff] }
  0x10   :  { %v804_v43 = vld [vmem:[%s2209_s4 + $0x38] sm:$0xff]  ;;  %v805_v45 = vld [vmem:[%s2209_s4 + $0x40] sm:$0xff] }
  0x11   :  { %1506 = vmatpush3.bf16.msra.mxu0 %v1503_v22  ;;  %1534 = vmatpush3.bf16.msra.mxu1 %v1875_v28  ;;  %v1727_v44 = vpack.c.bf16 %v804_v43, %v803_v42  ;;  %v808_v49 = vld [vmem:[%s2209_s4 + $0x58] sm:$0xff] }
  0x12   :  { %1508 = vmatprep.subr.bf16.mxu0 %v1507_v29  ;;  %1535 = vmatprep.subr.bf16.mxu1 %v1766_v2 }
  0x15   :  { %1510 = vmatpush3.bf16.msra.mxu0 %v1507_v29  ;;  %1537 = vmatpush3.bf16.msra.mxu1 %v1891_v34 }
  0x16   :  { %1512 = vmatprep.subr.bf16.mxu0 %v1511_v35  ;;  %1538 = vmatprep.subr.bf16.mxu1 %v1766_v2 }
  0x19   :  { %1514 = vmatpush3.bf16.msra.mxu0 %v1511_v35  ;;  %1540 = vmatpush3.bf16.msra.mxu1 %v1907_v40 }
  0x1a   :  { %1516 = vmatprep.subr.bf16.mxu0 %v1515_v41  ;;  %1541 = vmatprep.subr.bf16.mxu1 %v1766_v2 }
  0x1d   :  { %1518 = vmatpush3.bf16.msra.mxu0 %v1515_v41  ;;  %1543 = vmatpush3.bf16.msra.mxu1 %v1923_v46 }
  0x1e   :  { %1520 = vmatprep.subr.bf16.mxu0 %v1519_v47  ;;  %1544 = vmatprep.subr.bf16.mxu1 %v1766_v2 }
  0x21   :  { %1522 = vmatpush3.bf16.msra.mxu0 %v1519_v47  ;;  %1546 = vmatpush3.bf16.msra.mxu1 %v1933_v50 }
  0x22   :  { %1547 = vmatprep.subr.bf16.mxu0 %v1766_v2  ;;  %1571 = vmatprep.subr.bf16.mxu1 %v1766_v2 }
  0x24   :  { %1156 = vmatmul.mubr.f32.vlgmr.msra.gmra.mrb[0].mxu0 %v29_v51  ;;  %1200 = vmatmul.mubr.f32.vlgmr.msra.gmra.mrb[0].mxu1 %v1768_v4  ;;  %v809_v51 = vld [vmem:[%s2209_s4 + $0x60] sm:$0xff] }
  0x25   :  { %1549 = vmatpush3.bf16.msra.mxu0 %v1825_v9  ;;  %1573 = vmatpush3.bf16.msra.mxu1 %v1825_v9 }
  0x26   :  { %1550 = vmatprep.subr.bf16.mxu0 %v1766_v2  ;;  %1574 = vmatprep.subr.bf16.mxu1 %v1766_v2 }
  0x27   :  { %1269 = vmatprep.mubr.msk.f32.mxu1 %vm1767_vm0, %v1768_v4  ;;  %1158 = vmatprep.mubr.f32.mxu0 %v30_v52  ;;  %v810_v52 = vld [vmem:[%s2209_s4 + $0x68] sm:$0xff] }
  0x28   :  { %1159 = vmatmul.mubr.f32.gmra.mrb[2].mxu0 %v31_v53  ;;  %v1739_v53 = vpack.c.bf16 %v810_v52, %v809_v51 }
  0x29   :  { %1552 = vmatpush3.bf16.msra.mxu0 %v1840_v15  ;;  %1576 = vmatpush3.bf16.msra.mxu1 %v1840_v15 }
  0x2a   :  { %1553 = vmatprep.subr.bf16.mxu0 %v1766_v2  ;;  %1577 = vmatprep.subr.bf16.mxu1 %v1766_v2 }
  0x2b   :  { %1161 = vmatprep.mubr.f32.mxu0 %v32_v54  ;;  %v811_v54 = vld [vmem:[%s2209_s4 + $0x70] sm:$0xff] }
  0x2c   :  { %1162 = vmatmul.mubr.f32.gmra.mrb[4].mxu0 %v33_v55  ;;  %v812_v55 = vld [vmem:[%s2209_s4 + $0x78] sm:$0xff] }
  0x2d   :  { %1555 = vmatpush3.bf16.msra.mxu0 %v1856_v21  ;;  %1579 = vmatpush3.bf16.msra.mxu1 %v1856_v21 }
  0x2e   :  { %1556 = vmatprep.subr.bf16.mxu0 %v1766_v2  ;;  %1580 = vmatprep.subr.bf16.mxu1 %v1766_v2 }
  0x2f   :  { %1164 = vmatprep.mubr.f32.mxu0 %v34_v56  ;;  %v1743_v56 = vpack.c.bf16 %v812_v55, %v811_v54 }
  0x30   :  { %1165 = vmatmul.mubr.f32.gmra.mrb[6].mxu0 %v35_v57 }
  0x31   :  { %1558 = vmatpush3.bf16.msra.mxu0 %v1875_v28  ;;  %1582 = vmatpush3.bf16.msra.mxu1 %v1875_v28 }
  0x32   :  { %1559 = vmatprep.subr.bf16.mxu0 %v1766_v2  ;;  %1583 = vmatprep.subr.bf16.mxu1 %v1766_v2 }
  0x33   :  { %1234 = vmatprep.mubr.msk.f32.mxu0 %vm1767_vm0, %v1768_v4 }
  0x35   :  { %1561 = vmatpush3.bf16.msra.mxu0 %v1891_v34  ;;  %1585 = vmatpush3.bf16.msra.mxu1 %v1891_v34 }
  0x36   :  { %1562 = vmatprep.subr.bf16.mxu0 %v1766_v2  ;;  %1586 = vmatprep.subr.bf16.mxu1 %v1766_v2 }
  0x39   :  { %1564 = vmatpush3.bf16.msra.mxu0 %v1907_v40  ;;  %1588 = vmatpush3.bf16.msra.mxu1 %v1907_v40 }
  0x3a   :  { %1565 = vmatprep.subr.bf16.mxu0 %v1766_v2  ;;  %1589 = vmatprep.subr.bf16.mxu1 %v1766_v2 }
  0x3d   :  { %1567 = vmatpush3.bf16.msra.mxu0 %v1923_v46  ;;  %1591 = vmatpush3.bf16.msra.mxu1 %v1923_v46 }
  0x3e   :  { %1568 = vmatprep.subr.bf16.mxu0 %v1766_v2  ;;  %1592 = vmatprep.subr.bf16.mxu1 %v1766_v2 }
  0x41   :  { %1570 = vmatpush3.bf16.msra.mxu0 %v1933_v50  ;;  %1594 = vmatpush3.bf16.msra.mxu1 %v1933_v50 }
  0x42   :  { %1595 = vmatprep.subr.bf16.mxu0 %v1766_v2  ;;  %1619 = vmatprep.subr.bf16.mxu1 %v1766_v2 }
  0xf7   :  { %v1157_v59 = vpop.f32.mrb[0].mxu0  ;;  %v256_v60 = vpop.f32.mrb[0].mxu1 }
  0xf8   :  { %v125_v61 = vpop.f32.mrb[1].mxu0  ;;  %v1201_v62 = vpop.f32.mrb[1].mxu1  ;;  %v131_v11 = vadd.f32 %v1157_v59, %v2000_v58 }
  0xf9   :  { %v126_v63 = vadd.f32 %v2000_v58, %v125_v61 }
  0xfb   :  { %v260_v0 = vadd.f32 %v256_v60, %v126_v63  ;;  %v1160_v3 = vpop.f32.mrb[2].mxu0  ;;  %v938_v63 = vld [vmem:[%s2210_s5] ss:$0 sm:$0xff] }
  0xfc   :  { %v135_v5 = vpop.f32.mrb[3].mxu0  ;;  %v141_v23 = vadd.f32 %v1160_v3, %v2000_v58 }
  0xfd   :  { %1750 = vtanh.f32 %v260_v0  ;;  %v136_v17 = vadd.f32 %v2000_v58, %v135_v5 }
  0xff   :  { %v2024_v6 = vpop.f32.mrb[4].mxu0 }
 0x100   :  { %v2026_v7 = vpop.f32.mrb[5].mxu0 }
 0x101   :  { %v146_v29 = vadd.f32 %v2000_v58, %v2026_v7 }
 0x103   :  { %v2028_v8 = vpop.f32.mrb[6].mxu0 }
 0x104   :  { %v2030_v10 = vpop.f32.mrb[7].mxu0 }
 0x105   :  { %v156_v57 = vadd.f32 %v2000_v58, %v2030_v10 }
 0x107   :  { %v2003_v1 = vpop.eup %1750 }
 0x108   :  { %1235 = vmatmul.mubr.f32.vlgmr.msra.gmra.mrb[8].mxu0 %v2003_v1 }
 0x109   :  { %1597 = vmatpush3.bf16.msra.mxu0 %v1825_v9  ;;  %1304 = vmatprep.mubr.msk.f32.mxu0 %vm1767_vm0, %v1768_v4 }
 0x10a   :  { %1598 = vmatprep.subr.bf16.mxu0 %v1766_v2 }
 0x10d   :  { %1600 = vmatpush3.bf16.msra.mxu0 %v1840_v15 }
 0x10e   :  { %1601 = vmatprep.subr.bf16.mxu0 %v1766_v2 }
 0x111   :  { %1603 = vmatpush3.bf16.msra.mxu0 %v1856_v21 }
 0x112   :  { %1604 = vmatprep.subr.bf16.mxu0 %v1766_v2 }
 0x115   :  { %1606 = vmatpush3.bf16.msra.mxu0 %v1875_v28 }
 0x116   :  { %1607 = vmatprep.subr.bf16.mxu0 %v1766_v2 }
 0x119   :  { %1609 = vmatpush3.bf16.msra.mxu0 %v1891_v34 }
 0x11a   :  { %1610 = vmatprep.subr.bf16.mxu0 %v1766_v2 }
 0x11d   :  { %1612 = vmatpush3.bf16.msra.mxu0 %v1907_v40 }
 0x11e   :  { %1613 = vmatprep.subr.bf16.mxu0 %v1766_v2 }
 0x121   :  { %1615 = vmatpush3.bf16.msra.mxu0 %v1923_v46 }
 0x122   :  { %1616 = vmatprep.subr.bf16.mxu0 %v1766_v2 }
 0x125   :  { %1618 = vmatpush3.bf16.msra.mxu0 %v1933_v50 }
 0x126   :  { %1643 = vmatprep.subr.bf16.mxu0 %v1766_v2 }
 0x1db   :  { %v331_v12 = vpop.f32.mrb[8].mxu0 }
 0x1dc   :  { %v335_v13 = vadd.f32 %v331_v12, %v131_v11  ;;  %v1236_v14 = vpop.f32.mrb[9].mxu0 }
 0x1de   :  { %1752 = vtanh.f32 %v335_v13 }
 0x1e8   :  { %v2033_v16 = vpop.eup %1752 }
 0x1e9   :  { %1270 = vmatmul.mubr.f32.vlgmr.msra.gmra.mrb[2].mxu1 %v2033_v16 }
 0x1ea   :  { %1621 = vmatpush3.bf16.msra.mxu1 %v1825_v9  ;;  %1339 = vmatprep.mubr.msk.f32.mxu1 %vm1767_vm0, %v1768_v4 }
 0x1eb   :  { %1622 = vmatprep.subr.bf16.mxu1 %v1766_v2 }
 0x1ee   :  { %1624 = vmatpush3.bf16.msra.mxu1 %v1840_v15 }
 0x1ef   :  { %1625 = vmatprep.subr.bf16.mxu1 %v1766_v2 }
 0x1f2   :  { %1627 = vmatpush3.bf16.msra.mxu1 %v1856_v21 }
 0x1f3   :  { %1628 = vmatprep.subr.bf16.mxu1 %v1766_v2 }
 0x1f6   :  { %1630 = vmatpush3.bf16.msra.mxu1 %v1875_v28 }
 0x1f7   :  { %1631 = vmatprep.subr.bf16.mxu1 %v1766_v2 }
 0x1fa   :  { %1633 = vmatpush3.bf16.msra.mxu1 %v1891_v34 }
 0x1fb   :  { %1634 = vmatprep.subr.bf16.mxu1 %v1766_v2 }
 0x1fe   :  { %1636 = vmatpush3.bf16.msra.mxu1 %v1907_v40 }
 0x1ff   :  { %1637 = vmatprep.subr.bf16.mxu1 %v1766_v2 }
 0x202   :  { %1639 = vmatpush3.bf16.msra.mxu1 %v1923_v46 }
 0x203   :  { %1640 = vmatprep.subr.bf16.mxu1 %v1766_v2 }
 0x206   :  { %1642 = vmatpush3.bf16.msra.mxu1 %v1933_v50 }
 0x207   :  { %1667 = vmatprep.subr.bf16.mxu1 %v1766_v2 }
 0x2bc   :  { %v406_v18 = vpop.f32.mrb[2].mxu1 }
 0x2bd   :  { %v410_v19 = vadd.f32 %v406_v18, %v136_v17  ;;  %v1271_v20 = vpop.f32.mrb[3].mxu1  ;;  %v161_v17 = vadd.f32 %v2028_v8, %v2000_v58 }
 0x2bf   :  { %1754 = vtanh.f32 %v410_v19 }
 0x2c9   :  { %v2055_v22 = vpop.eup %1754 }
 0x2ca   :  { %1305 = vmatmul.mubr.f32.vlgmr.msra.gmra.mrb[10].mxu0 %v2055_v22 }
 0x2cb   :  { %1645 = vmatpush3.bf16.msra.mxu0 %v1825_v9  ;;  %1374 = vmatprep.mubr.msk.f32.mxu0 %vm1767_vm0, %v1768_v4 }
 0x2cc   :  { %1646 = vmatprep.subr.bf16.mxu0 %v1766_v2 }
 0x2cf   :  { %1648 = vmatpush3.bf16.msra.mxu0 %v1840_v15 }
 0x2d0   :  { %1649 = vmatprep.subr.bf16.mxu0 %v1766_v2 }
 0x2d3   :  { %1651 = vmatpush3.bf16.msra.mxu0 %v1856_v21 }
 0x2d4   :  { %1652 = vmatprep.subr.bf16.mxu0 %v1766_v2 }
 0x2d7   :  { %1654 = vmatpush3.bf16.msra.mxu0 %v1875_v28 }
 0x2d8   :  { %1655 = vmatprep.subr.bf16.mxu0 %v1766_v2 }
 0x2db   :  { %1657 = vmatpush3.bf16.msra.mxu0 %v1891_v34 }
 0x2dc   :  { %1658 = vmatprep.subr.bf16.mxu0 %v1766_v2 }
 0x2df   :  { %1660 = vmatpush3.bf16.msra.mxu0 %v1907_v40 }
 0x2e0   :  { %1661 = vmatprep.subr.bf16.mxu0 %v1766_v2 }
 0x2e3   :  { %1663 = vmatpush3.bf16.msra.mxu0 %v1923_v46 }
 0x2e4   :  { %1664 = vmatprep.subr.bf16.mxu0 %v1766_v2 }
 0x2e7   :  { %1666 = vmatpush3.bf16.msra.mxu0 %v1933_v50 }
 0x2e8   :  { %1691 = vmatprep.subr.bf16.mxu0 %v1766_v2 }
 0x39d   :  { %v481_v24 = vpop.f32.mrb[10].mxu0 }
 0x39e   :  { %v485_v25 = vadd.f32 %v481_v24, %v141_v23  ;;  %v1306_v26 = vpop.f32.mrb[11].mxu0 }
 0x3a0   :  { %1756 = vtanh.f32 %v485_v25 }
 0x3aa   :  { %v2077_v27 = vpop.eup %1756 }
 0x3ab   :  { %1340 = vmatmul.mubr.f32.vlgmr.msra.gmra.mrb[4].mxu1 %v2077_v27 }
 0x3ac   :  { %1669 = vmatpush3.bf16.msra.mxu1 %v1825_v9  ;;  %1409 = vmatprep.mubr.msk.f32.mxu1 %vm1767_vm0, %v1768_v4 }
 0x3ad   :  { %1670 = vmatprep.subr.bf16.mxu1 %v1766_v2 }
 0x3b0   :  { %1672 = vmatpush3.bf16.msra.mxu1 %v1840_v15 }
 0x3b1   :  { %1673 = vmatprep.subr.bf16.mxu1 %v1766_v2 }
 0x3b4   :  { %1675 = vmatpush3.bf16.msra.mxu1 %v1856_v21 }
 0x3b5   :  { %1676 = vmatprep.subr.bf16.mxu1 %v1766_v2 }
 0x3b8   :  { %1678 = vmatpush3.bf16.msra.mxu1 %v1875_v28 }
 0x3b9   :  { %1679 = vmatprep.subr.bf16.mxu1 %v1766_v2 }
 0x3bc   :  { %1681 = vmatpush3.bf16.msra.mxu1 %v1891_v34 }
 0x3bd   :  { %1682 = vmatprep.subr.bf16.mxu1 %v1766_v2 }
 0x3c0   :  { %1684 = vmatpush3.bf16.msra.mxu1 %v1907_v40 }
 0x3c1   :  { %1685 = vmatprep.subr.bf16.mxu1 %v1766_v2 }
 0x3c4   :  { %1687 = vmatpush3.bf16.msra.mxu1 %v1923_v46 }
 0x3c5   :  { %1688 = vmatprep.subr.bf16.mxu1 %v1766_v2 }
 0x3c8   :  { %1690 = vmatpush3.bf16.msra.mxu1 %v1933_v50 }
 0x47e   :  { %v556_v30 = vpop.f32.mrb[4].mxu1 }
 0x47f   :  { %v560_v31 = vadd.f32 %v556_v30, %v146_v29  ;;  %v1341_v32 = vpop.f32.mrb[5].mxu1 }
 0x481   :  { %1758 = vtanh.f32 %v560_v31 }
 0x48b   :  { %v2099_v33 = vpop.eup %1758 }
 0x48c   :  { %1375 = vmatmul.mubr.f32.vlgmr.msra.gmra.mrb[12].mxu0 %v2099_v33 }
 0x48d   :  { %1693 = vmatpush3.bf16.msra.mxu0 %v1825_v9  ;;  %1444 = vmatprep.mubr.msk.f32.mxu0 %vm1767_vm0, %v1768_v4  ;;  %v797_v4 = vld [vmem:[%s2209_s4] sm:$0xff]  ;;  %v798_v9 = vld [vmem:[%s2209_s4 + $0x8] sm:$0xff] }
 0x48e   :  { %1694 = vmatprep.subr.bf16.mxu0 %v1766_v2 }
 0x491   :  { %1696 = vmatpush3.bf16.msra.mxu0 %v1840_v15  ;;  %v1715_v15 = vpack.c.bf16 %v798_v9, %v797_v4 }
 0x492   :  { %1697 = vmatprep.subr.bf16.mxu0 %v1766_v2 }
 0x493   :  { %1716 = vmatprep.subr.bf16.mxu1 %v1715_v15 }
 0x495   :  { %1699 = vmatpush3.bf16.msra.mxu0 %v1856_v21  ;;  %v151_v21 = vadd.f32 %v2024_v6, %v2000_v58 }
 0x496   :  { %1700 = vmatprep.subr.bf16.mxu0 %v1766_v2 }
 0x499   :  { %1702 = vmatpush3.bf16.msra.mxu0 %v1875_v28 }
 0x49a   :  { %1703 = vmatprep.subr.bf16.mxu0 %v1766_v2 }
 0x49d   :  { %1705 = vmatpush3.bf16.msra.mxu0 %v1891_v34 }
 0x49e   :  { %1706 = vmatprep.subr.bf16.mxu0 %v1766_v2 }
 0x4a1   :  { %1708 = vmatpush3.bf16.msra.mxu0 %v1907_v40  ;;  %v802_v40 = vld [vmem:[%s2209_s4 + $0x28] sm:$0xff] }
 0x4a2   :  { %1709 = vmatprep.subr.bf16.mxu0 %v1766_v2  ;;  %v1723_v41 = vpack.c.bf16 %v802_v40, %v801_v39 }
 0x4a5   :  { %1711 = vmatpush3.bf16.msra.mxu0 %v1923_v46  ;;  %v806_v46 = vld [vmem:[%s2209_s4 + $0x48] sm:$0xff] }
 0x4a6   :  { %1712 = vmatprep.subr.bf16.mxu0 %v1766_v2  ;;  %v799_v2 = vld [vmem:[%s2209_s4 + $0x10] sm:$0xff]  ;;  %v1731_v47 = vpack.c.bf16 %v806_v46, %v805_v45 }
 0x4a7   :  { %v1719_v37 = vpack.c.bf16 %v800_v36, %v799_v2 }
 0x4a9   :  { %1714 = vmatpush3.bf16.msra.mxu0 %v1933_v50  ;;  %v1735_v50 = vpack.c.bf16 %v808_v49, %v807_v48 }
 0x55f   :  { %v631_v28 = vpop.f32.mrb[12].mxu0 }
 0x560   :  { %v635_v34 = vadd.f32 %v631_v28, %v151_v21  ;;  %v1376_v35 = vpop.f32.mrb[13].mxu0 }
 0x562   :  { %1760 = vtanh.f32 %v635_v34 }
 0x56c   :  { %v1761_v38 = vpop.eup %1760 }
 0x56d   :  { %1410 = vmatmul.mubr.f32.vlgmr.msra.gmra.mrb[6].mxu1 %v1761_v38 }
 0x56e   :  { %1718 = vmatpush3.bf16.msra.mxu1 %v1715_v15  ;;  %1479 = vmatprep.mubr.f32.mxu1 %v2003_v1 }
 0x56f   :  { %1720 = vmatprep.subr.bf16.mxu1 %v1719_v37 }
 0x572   :  { %1722 = vmatpush3.bf16.msra.mxu1 %v1719_v37 }
 0x573   :  { %1724 = vmatprep.subr.bf16.mxu1 %v1723_v41 }
 0x576   :  { %1726 = vmatpush3.bf16.msra.mxu1 %v1723_v41 }
 0x577   :  { %1728 = vmatprep.subr.bf16.mxu1 %v1727_v44 }
 0x57a   :  { %1730 = vmatpush3.bf16.msra.mxu1 %v1727_v44 }
 0x57b   :  { %1732 = vmatprep.subr.bf16.mxu1 %v1731_v47 }
 0x57e   :  { %1734 = vmatpush3.bf16.msra.mxu1 %v1731_v47 }
 0x57f   :  { %1736 = vmatprep.subr.bf16.mxu1 %v1735_v50 }
 0x582   :  { %1738 = vmatpush3.bf16.msra.mxu1 %v1735_v50 }
 0x583   :  { %1740 = vmatprep.subr.bf16.mxu1 %v1739_v53 }
 0x586   :  { %1742 = vmatpush3.bf16.msra.mxu1 %v1739_v53 }
 0x587   :  { %1744 = vmatprep.subr.bf16.mxu1 %v1743_v56 }
 0x58a   :  { %1746 = vmatpush3.bf16.msra.mxu1 %v1743_v56 }
 0x58d   :  { %1480 = vmatmul.mubr.f32.vlgmr.msra.gmra.mrb[8].mxu1 %v2033_v16 }
 0x58e   :  { %1482 = vmatprep.mubr.f32.mxu1 %v2055_v22 }
 0x591   :  { %1483 = vmatmul.mubr.f32.gmra.mrb[10].mxu1 %v2077_v27 }
 0x592   :  { %1485 = vmatprep.mubr.f32.mxu1 %v2099_v33 }
 0x595   :  { %1486 = vmatmul.mubr.f32.gmra.mrb[12].mxu1 %v1761_v38 }
 0x640   :  { %v706_v59 = vpop.f32.mrb[6].mxu1 }
 0x641   :  { %v710_v60 = vadd.f32 %v706_v59, %v156_v57  ;;  %v1411_v61 = vpop.f32.mrb[7].mxu1 }
 0x643   :  { %1762 = vtanh.f32 %v710_v60 }
 0x64d   :  { %v1763_v62 = vpop.eup %1762 }
 0x64e   :  { %1445 = vmatmul.mubr.f32.vlgmr.msra.gmra.mrb[14].mxu0 %v1763_v62  ;;  %1488 = vmatprep.mubr.f32.mxu1 %v1763_v62 }
 0x660   :  { %v1481_v0 = vpop.f32.mrb[8].mxu1 }
 0x661   :  { %v892_v1 = vadd.f32 %v1481_v0, %v938_v63  ;;  %v886_v3 = vpop.f32.mrb[9].mxu1 }
 0x662   :  { %v887_v5 = vadd.f32 %v938_v63, %v886_v3 }
 0x663   :  { %926 = vst [vmem:[%s2211_s6 + $0x8] sm:$0xff] %v892_v1 }
 0x664   :  { %925 = vst [vmem:[%s2211_s6] sm:$0xff] %v887_v5  ;;  %v1484_v6 = vpop.f32.mrb[10].mxu1 }
 0x665   :  { %v902_v7 = vadd.f32 %v1484_v6, %v938_v63  ;;  %v896_v10 = vpop.f32.mrb[11].mxu1 }
 0x666   :  { %v897_v11 = vadd.f32 %v938_v63, %v896_v10 }
 0x667   :  { %928 = vst [vmem:[%s2211_s6 + $0x18] sm:$0xff] %v902_v7 }
 0x668   :  { %927 = vst [vmem:[%s2211_s6 + $0x10] sm:$0xff] %v897_v11  ;;  %v1487_v12 = vpop.f32.mrb[12].mxu1 }
 0x669   :  { %v912_v13 = vadd.f32 %v1487_v12, %v938_v63  ;;  %v906_v14 = vpop.f32.mrb[13].mxu1 }
 0x66a   :  { %v907_v16 = vadd.f32 %v938_v63, %v906_v14 }
 0x66b   :  { %930 = vst [vmem:[%s2211_s6 + $0x28] sm:$0xff] %v912_v13 }
 0x66c   :  { %929 = vst [vmem:[%s2211_s6 + $0x20] sm:$0xff] %v907_v16 }
 0x721   :  { %v781_v18 = vpop.f32.mrb[14].mxu0 }
 0x722   :  { %v785_v19 = vadd.f32 %v781_v18, %v161_v17  ;;  %v1446_v20 = vpop.f32.mrb[15].mxu0 }
 0x724   :  { %1764 = vtanh.f32 %v785_v19 }
 0x72e   :  { %v1765_v22 = vpop.eup %1764 }
 0x72f   :  { %1489 = vmatmul.mubr.f32.gmra.mrb[14].mxu1 %v1765_v22 }
 0x802   :  { %v1490_v23 = vpop.f32.mrb[14].mxu1 }
 0x803   :  { %v922_v24 = vadd.f32 %v1490_v23, %v938_v63  ;;  %v916_v25 = vpop.f32.mrb[15].mxu1 }
 0x804   :  { %v917_v26 = vadd.f32 %v938_v63, %v916_v25 }
 0x805   :  { %932 = vst [vmem:[%s2211_s6 + $0x38] sm:$0xff] %v922_v24 }
 0x806   :  { %931 = vst [vmem:[%s2211_s6 + $0x30] sm:$0xff] %v917_v26 }

</bundles_post_ra>
